<compile_context>
chip_gen: v6e
topology: v6e:2x2x1
jax: 0.10.0
libtpu: 0.0.40
codegen_flags: <defaults>
</compile_context>

<pallas_src>
import jax
import jax.numpy as jnp
from jax.experimental import pallas as pl
from jax.experimental.pallas import tpu as pltpu


def _round_up(x: int, m: int) -> int:
    return (x + m - 1) // m * m


def _vmem_limit_bytes() -> int:
    """Per-generation VMEM limit: ~75% of physical (v5e/v6e 128MiB -> 96MiB,
    v7x 64MiB -> 48MiB); conservative 48MiB fallback if the query fails."""
    try:
        cap = pltpu.get_tpu_info().vmem_capacity_bytes
    except Exception:
        cap = 64 * 1024 * 1024
    return int(min(cap * 3 // 4, 110 * 1024 * 1024))


# ---------------------------------------------------------------------------
# Kernels
# ---------------------------------------------------------------------------

def _log_softmax_store(logits, o_ref):
    # Numerically stable log-softmax over the (padded) class axis; padded
    # classes carry a -1e30 bias so they never win the max / add to the sum.
    m = jnp.max(logits, axis=-1, keepdims=True)
    shifted = logits - m
    lse = jnp.log(jnp.sum(jnp.exp(shifted), axis=-1, keepdims=True))
    o_ref[...] = (shifted - lse).astype(o_ref.dtype)


def _classifier_kernel_single(x_ref, w_ref, b_ref, o_ref):
    # Single reduction step: no scratch accumulator needed.
    logits = jnp.dot(x_ref[...], w_ref[...], preferred_element_type=jnp.float32)
    logits = logits + b_ref[...]
    _log_softmax_store(logits, o_ref)


def _classifier_kernel_multi(x_ref, w_ref, b_ref, o_ref, acc_ref):
    # x_ref: (TB, TF) bf16, w_ref: (TF, C_pad) bf16, b_ref: (1, C_pad) f32
    # o_ref: (TB, C_pad), acc_ref: (TB, C_pad) f32 scratch accumulator.
    k = pl.program_id(1)

    @pl.when(k == 0)
    def _():
        # Initialize with the bias directly (saves a separate add pass).
        acc_ref[...] = jnp.broadcast_to(b_ref[...], acc_ref.shape)

    acc_ref[...] += jnp.dot(x_ref[...], w_ref[...],
                            preferred_element_type=jnp.float32)

    @pl.when(k == pl.num_programs(1) - 1)
    def _():
        _log_softmax_store(acc_ref[...], o_ref)


# ---------------------------------------------------------------------------
# Wrapper
# ---------------------------------------------------------------------------

def prepare_params(w, b, *, operand_dtype=jnp.bfloat16):
    """Pad class dim to a multiple of 128 and cast W to the MXU operand dtype.
    Done once at init time (hoisted out of the hot path)."""
    F, C = w.shape
    assert b.shape == (C,)
    C_pad = _round_up(C, 128)
    if C_pad != C:
        w = jnp.pad(w, ((0, 0), (0, C_pad - C)))
        # padded classes: zero weights + very negative bias => never affect
        # the max / sum-exp (exp underflows to exactly 0 in f32).
        b = jnp.pad(b.astype(jnp.float32), (0, C_pad - C), constant_values=-1e30)
    return w.astype(operand_dtype), b.astype(jnp.float32).reshape(1, C_pad), C


def classifier_apply(x, w_p, b_p, num_classes, *, block_b: int = 512,
                     block_f: int = 1024, out_dtype=jnp.float32,
                     operand_dtype=jnp.bfloat16, force_tf=None):
    """x: (B, F), w_p: (F, C_pad) operand_dtype, b_p: (1, C_pad) f32
    -> (B, num_classes) log-probs in out_dtype."""
    B, F = x.shape
    Fw, C_pad = w_p.shape
    assert F == Fw and b_p.shape == (1, C_pad)

    in_itemsize = jnp.dtype(operand_dtype).itemsize
    out_itemsize = jnp.dtype(out_dtype).itemsize

    vmem_limit = _vmem_limit_bytes()
    budget = int(vmem_limit * 0.85)

    # ---- F (reduction) tiling: keep W fully resident (DMA'd exactly once,
    # constant index_map) whenever it fits a slice of the VMEM budget.
    if force_tf is not None:
        TF = int(force_tf)
        F_pad = F if F % TF == 0 else _round_up(F, TF)
    elif F * C_pad * in_itemsize <= budget // 3:
        TF, F_pad = F, F
    else:
        # Tile F; prefer a 128-multiple tile that divides F exactly, otherwise
        # zero-pad F (zero x columns / zero w rows contribute nothing).
        tf_cap = max(128, min((block_f // 128) * 128, _round_up(F, 128)))
        cand = tf_cap
        while cand >= 128 and F % cand != 0:
            cand -= 128
        if cand >= 128:
            TF, F_pad = cand, F
        else:
            TF, F_pad = tf_cap, _round_up(F, tf_cap)

    if F_pad != F:
        x = jnp.pad(x, ((0, 0), (0, F_pad - F)))
        w_p = jnp.pad(w_p, ((0, F_pad - F), (0, 0)))

    # ---- Batch tiling: no wrapper-side padding; ragged last tile is masked
    # at writeback. bf16 packs 16 rows/vreg, so round to 16 sublanes.
    if B <= 16:
        TB = B                      # full-dim block (any size allowed)
    else:
        TB = min(block_b, _round_up(B, 16))
        # At least two batch tiles so the "parallel" axis feeds both v7x cores.
        while TB > 16 and pl.cdiv(B, TB) < 2:
            TB = _round_up(TB // 2, 16)

    grid_k = F_pad // TF

    # ---- Explicit VMEM accounting (double-buffered x/w/out + f32 acc + bias).
    def _fits(tb, tf):
        acc = tb * C_pad * 4 if grid_k > 1 else 0
        used = (2 * tb * tf * in_itemsize        # x tiles (2 buffers)
                + 2 * tf * C_pad * in_itemsize   # w tiles
                + 2 * tb * C_pad * out_itemsize  # out tiles
                + acc
                + 2 * C_pad * 4)                 # bias
        return used <= budget

    while TB > 16 and not _fits(TB, TF):
        TB = _round_up(TB // 2, 16)

    grid_b = pl.cdiv(B, TB)
    grid = (grid_b, grid_k)

    x_op = x.astype(operand_dtype)

    # Cost estimate: account for W re-streaming when F is actually tiled.
    w_streams = 1 if grid_k == 1 else grid_b
    cost = pl.CostEstimate(
        flops=2 * B * F_pad * C_pad,
        transcendentals=2 * B * C_pad,           # exp + log per output elem
        bytes_accessed=(B * F_pad * in_itemsize
                        + w_streams * F_pad * C_pad * in_itemsize
                        + C_pad * 4
                        + B * C_pad * out_itemsize),
    )

    if grid_k == 1:
        kernel = _classifier_kernel_single
        scratch = []
    else:
        kernel = _classifier_kernel_multi
        scratch = [pltpu.VMEM((TB, C_pad), jnp.float32)]

    out = pl.pallas_call(
        kernel,
        out_shape=jax.ShapeDtypeStruct((B, C_pad), out_dtype),
        grid=grid,
        in_specs=[
            pl.BlockSpec((TB, TF), lambda i, k: (i, k)),      # activations
            pl.BlockSpec((TF, C_pad), lambda i, k: (k, 0)),   # weights
            pl.BlockSpec((1, C_pad), lambda i, k: (0, 0)),    # bias (resident)
        ],
        out_specs=pl.BlockSpec((TB, C_pad), lambda i, k: (i, 0)),
        scratch_shapes=scratch,
        compiler_params=pltpu.CompilerParams(
            dimension_semantics=("parallel", "arbitrary"),
            vmem_limit_bytes=vmem_limit,
        ),
        cost_estimate=cost,
    )(x_op, w_p, b_p)

    # Avoid the slice copy when the class dim needed no padding.
    return out if C_pad == num_classes else out[:, :num_classes]


def classifier_forward(x, w, b, *, block_b: int = 512, block_f: int = 1024,
                       out_dtype=jnp.float32, operand_dtype=jnp.bfloat16,
                       force_tf=None):
    """x: (B, F) f32, w: (F, C) f32, b: (C,) f32 -> (B, C) log-probs."""
    w_p, b_p, C = prepare_params(w, b, operand_dtype=operand_dtype)
    return classifier_apply(x, w_p, b_p, C, block_b=block_b, block_f=block_f,
                            out_dtype=out_dtype, operand_dtype=operand_dtype,
                            force_tf=force_tf)


if __name__ == "__main__":
    # Small shapes consistent with the module defaults.
    feature_dim = 32
    num_classes = 10
    batch = 8

    key = jax.random.PRNGKey(0)
    kx, kw, kb = jax.random.split(key, 3)

    x = jax.random.normal(kx, (batch, feature_dim), dtype=jnp.float32)
    w = jax.random.normal(kw, (feature_dim, num_classes), dtype=jnp.float32) * 0.05
    b = jax.random.normal(kb, (num_classes,), dtype=jnp.float32) * 0.05

    out = classifier_forward(x, w, b)
    out = jax.block_until_ready(out)

    ref = jax.nn.log_softmax(x @ w + b, axis=-1)
    assert out.shape == (batch, num_classes)
    assert jnp.allclose(out, ref, atol=3e-2, rtol=3e-2), \
        float(jnp.max(jnp.abs(out - ref)))
    probs_sum = jnp.sum(jnp.exp(out.astype(jnp.float32)), axis=-1)
    assert jnp.allclose(probs_sum, 1.0, atol=1e-3)

    # Second check: ragged batch (masked last tile, 2 batch tiles) + a forced
    # F-reduction tiling to exercise the multi-K accumulator kernel.
    x2 = jax.random.normal(kb, (24, 256), dtype=jnp.float32)
    w2 = jax.random.normal(kw, (256, num_classes), dtype=jnp.float32) * 0.05
    b2 = jax.random.normal(kx, (num_classes,), dtype=jnp.float32) * 0.05
    out2 = jax.block_until_ready(classifier_forward(x2, w2, b2, force_tf=128))
    ref2 = jax.nn.log_softmax(x2 @ w2 + b2, axis=-1)
    assert out2.shape == (24, num_classes)
    assert jnp.allclose(out2, ref2, atol=5e-2, rtol=5e-2), \
        float(jnp.max(jnp.abs(out2 - ref2)))

    print("KERNEL_OK")
</pallas_src>

<mosaic_0001>
module attributes {stable_mosaic.version = 11 : i64} {
  func.func @_classifier_kernel_single(%arg0: i32, %arg1: i32, %arg2: memref<8x32xbf16, #tpu.memory_space<vmem>>, %arg3: memref<32x128xbf16, #tpu.memory_space<vmem>>, %arg4: memref<1x128xf32, #tpu.memory_space<vmem>>, %arg5: memref<8x128xf32, #tpu.memory_space<vmem>>) attributes {dimension_semantics = [#tpu.dimension_semantics<parallel>, #tpu.dimension_semantics<arbitrary>], iteration_bounds = array<i64: 1, 1>, scalar_prefetch = 0 : i64, scratch_operands = 0 : i64, tpu.core_type = #tpu.core_type<tc>, window_params = [{transform_indices = @transform_0, window_bounds = array<i64: 8, 32>}, {transform_indices = @transform_1, window_bounds = array<i64: 32, 128>}, {pipeline_mode = #tpu.pipeline_mode<synchronous>, transform_indices = @transform_2, window_bounds = array<i64: 1, 128>}, {transform_indices = @transform_3, window_bounds = array<i64: 8, 128>}]} {
    %c0 = arith.constant 0 : index
    %c0_0 = arith.constant 0 : index
    %0 = vector.load %arg2[%c0, %c0_0] : memref<8x32xbf16, #tpu.memory_space<vmem>>, vector<8x32xbf16>
    %c0_1 = arith.constant 0 : index
    %c0_2 = arith.constant 0 : index
    %1 = vector.load %arg3[%c0_1, %c0_2] : memref<32x128xbf16, #tpu.memory_space<vmem>>, vector<32x128xbf16>
    %cst = arith.constant dense<0.000000e+00> : vector<8x128xf32>
    %2 = tpu.matmul %0, %1, %cst {dimension_numbers = #tpu.dot_dimension_numbers<[1], [0], [0], [1], [0, 0, 1, 1], [], []>} : vector<8x32xbf16>, vector<32x128xbf16>, vector<8x128xf32> -> vector<8x128xf32>
    %c0_3 = arith.constant 0 : index
    %c0_4 = arith.constant 0 : index
    %3 = vector.load %arg4[%c0_3, %c0_4] : memref<1x128xf32, #tpu.memory_space<vmem>>, vector<1x128xf32>
    %4 = vector.broadcast %3 : vector<1x128xf32> to vector<8x128xf32>
    %5 = arith.addf %2, %4 : vector<8x128xf32>
    %cst_5 = arith.constant dense<0xFF800000> : vector<8xf32>
    %6 = vector.multi_reduction <maximumf>, %5, %cst_5 [1] : vector<8x128xf32> to vector<8xf32>
    %7 = vector.shape_cast %6 : vector<8xf32> to vector<8x1xf32>
    %8 = vector.broadcast %7 : vector<8x1xf32> to vector<8x128xf32>
    %9 = arith.subf %5, %8 : vector<8x128xf32>
    %10 = math.exp %9 : vector<8x128xf32>
    %cst_6 = arith.constant dense<0.000000e+00> : vector<8xf32>
    %11 = vector.multi_reduction <add>, %10, %cst_6 [1] : vector<8x128xf32> to vector<8xf32>
    %12 = vector.shape_cast %11 : vector<8xf32> to vector<8x1xf32>
    %13 = math.log %12 : vector<8x1xf32>
    %14 = vector.broadcast %13 : vector<8x1xf32> to vector<8x128xf32>
    %15 = arith.subf %9, %14 : vector<8x128xf32>
    %c0_7 = arith.constant 0 : index
    %c0_8 = arith.constant 0 : index
    %16 = vector.load %arg5[%c0_7, %c0_8] : memref<8x128xf32, #tpu.memory_space<vmem>>, vector<8x128xf32>
    tpu.vector_store %arg5[%c0_7, %c0_8], %15 {strides = array<i32>} : memref<8x128xf32, #tpu.memory_space<vmem>>, vector<8x128xf32>,
    return
  }
  func.func @transform_0(%arg0: i32, %arg1: i32) -> (i32, i32) {
    %c0_i32 = arith.constant 0 : i32
    return %arg0, %arg1 : i32, i32
  }
  func.func @transform_1(%arg0: i32, %arg1: i32) -> (i32, i32) {
    %c0_i32 = arith.constant 0 : i32
    %c0_i32_0 = arith.constant 0 : i32
    return %arg1, %c0_i32 : i32, i32
  }
  func.func @transform_2(%arg0: i32, %arg1: i32) -> (i32, i32) {
    %c0_i32 = arith.constant 0 : i32
    %c0_i32_0 = arith.constant 0 : i32
    %c0_i32_1 = arith.constant 0 : i32
    return %c0_i32, %c0_i32_0 : i32, i32
  }
  func.func @transform_3(%arg0: i32, %arg1: i32) -> (i32, i32) {
    %c0_i32 = arith.constant 0 : i32
    %c0_i32_0 = arith.constant 0 : i32
    return %arg0, %c0_i32 : i32, i32
  }
}

</mosaic_0001>

<bundles_post_ra>
// kernel: tpu_custom_call.1
= control target key start
LH: loop header
LB: loop body
LE: loop exit
PB: predicated region body
PF: predicated region fallthrough
CT: control target
= control target key end

     0   :  { %8 = vsyncpa [#allocation3], 0  ;;  %s270_s0 = inlined_call_operand.hbm [shape: bf16[8,32], index: 0, kind: input, shape index: {}]   ;;  %s271_s1 = inlined_call_operand.hbm [shape: bf16[32,128], index: 1, kind: input, shape index: {}]   ;;  %s272_s2 = inlined_call_operand.vmem [shape: f32[1,128], index: 2, kind: input, shape index: {}]   ;;  %s273_s3 = inlined_call_operand.hbm [shape: f32[8,128], index: 3, kind: output, shape index: {}]  }
   0x1   :  { %9 = vsyncpa [#allocation6], 0 }
   0x2   :  { %10 = vsyncpa [#allocation4], 0  ;;  %s231_s12 = smov [#allocation2]   ;;  %s232_s14 = smov [#allocation5]  }
   0x3   :  { %s17_s13 = sshll.u32 %s231_s12, 4  ;;  %s26_s15 = sshll.u32 %s232_s14, 4  ;;  %s18_s13 = int_to_ptr.vmem [resolvable:$true] %s17_s13  ;;  %s27_s15 = int_to_ptr.vmem [resolvable:$true] %s26_s15 }
   0x4   :  { %s173_s16 = scalar_lea.vmem %s18_s13, 64  ;;  %p178_p1 = scmp.lt.s32.totalorder %s18_s13, %s18_s13 }
   0x5   :  { %p174_p0 = scmp.ne.s32.totalorder %s18_s13, %s173_s16  ;;  %p179_p2 = scmp.lt.s32.totalorder %s173_s16, %s173_s16 }
   0x7   :  { %p180_p3 = por %p179_p2, %p178_p1 }
   0x9   :  { %p181_p4 = pnand %p180_p3, %p174_p0 }
   0xb   :  { %184 = shalt.err (!%p181_p4)
}
   0xc   :  { %20 = dma.hbm_to_vmem [thread:$0]  %s270_s0, 64, %s18_s13, [#allocation3]  }
   0xd   :  { %s193_s19 = scalar_lea.vmem %s27_s15, 256  ;;  %p198_p6 = scmp.lt.s32.totalorder %s27_s15, %s27_s15 }
   0xe   :  { %p194_p5 = scmp.ne.s32.totalorder %s27_s15, %s193_s19  ;;  %p199_p7 = scmp.lt.s32.totalorder %s193_s19, %s193_s19 }
  0x10   :  { %p200_p8 = por %p199_p7, %p198_p6 }
  0x12   :  { %p201_p9 = pnand %p200_p8, %p194_p5 }
  0x14   :  { %204 = shalt.err (!%p201_p9)
}
  0x15   :  { %s233_s20 = smov 64   ;;  %s234_s21 = smov 4  }
  0x16   :  { %32 = dma.hbm_to_vmem [thread:$0]  %s271_s1, 256, %s27_s15, [#allocation6], %s233_s20, %s233_s20, %s234_s21  }
  0x17   :  { %225 = dma.done.wait [#allocation3], 64  }
  0x18   :  { %226 = vsyncadd [#allocation3], 4294967232 }
  0x19   :  { %227 = dma.done.wait [#allocation6], 256  }
  0x1a   :  { %228 = vsyncadd [#allocation6], 4294967040  ;;  %v235_v0 = vmov 0.0   ;;  %vm236_vm0 = vmmov 0   ;;  %v159_v1 = vld [vmem:[#allocation5 + $0x8] sm:$0xff]   ;;  %v160_v2 = vld [vmem:[#allocation5] sm:$0xff]  }
  0x1b   :  { %144 = vmatprep.subr.bf16.mxu0 %v235_v0  ;;  %148 = vmatprep.mubr.msk.bf16.mxu0 %vm236_vm0, %v235_v0  ;;  %v42_v3 = vld [vmem:[#allocation2] sm:$0xf]  ;;  %vm66_vm1 = vcmask 261120   ;;  %s237_s1 = smov [#allocation7]  }
  0x1c   :  { %145 = vmatpush3.bf16.msra.mxu0 %v159_v1  ;;  %v137_v4 = vld [vmem:[%s272_s2] ss:$0 sm:$0xff]  ;;  %s127_s25 = sshll.u32 %s237_s1, 4  ;;  %s128_s25 = int_to_ptr.vmem [resolvable:$true] %s127_s25 }
  0x1d   :  { %146 = vmatprep.subr.bf16.mxu0 %v235_v0  ;;  %s205_s2 = scalar_lea.vmem %s128_s25, 128  ;;  %p210_p11 = scmp.lt.s32.totalorder %s128_s25, %s128_s25 }
  0x1e   :  { %p206_p10 = scmp.ne.s32.totalorder %s128_s25, %s205_s2  ;;  %p211_p12 = scmp.lt.s32.totalorder %s205_s2, %s205_s2 }
  0x20   :  { %147 = vmatpush3.bf16.msra.mxu0 %v160_v2  ;;  %p212_p13 = por %p211_p12, %p210_p11 }
  0x22   :  { %p213_p0 = pnand %p212_p13, %p206_p10 }
  0x23   :  { %149 = vmatmul.mubr.msk.bf16.vlgmr.msra.gmra.mxu0 %vm66_vm1, %v42_v3 }
  0xe3   :  { %v104_v5 = vpop.f32.mrf.mxu0 }
  0xe4   :  { %v105_v6 = vadd.f32 %v137_v4, %v104_v5 }
  0xe5   :  { %v150_v7 = vpop.f32.mrf.mxu0 }
  0xe6   :  { %110 = vmax.xlane.f32.xlu0 %v105_v6 }
  0xe7   :  { %v107_v8 = vpop.f32.mrf.mxu0 }
  0xe9   :  { %v151_v9 = vpop.f32.mrf.mxu0 }
 0x16f   :  { %v111_v10 = vpop.xlane.xlu0 %110 }
 0x170   :  { %v112_v11 = vsub.f32 %v105_v6, %v111_v10 }
 0x172   :  { %v113_v12 = vmul.f32 1.442695, %v112_v11 }
 0x174   :  { %161 = vpow2.f32 %v113_v12 }
 0x181   :  { %v162_v13 = vpop.eup %161 }
 0x182   :  { %115 = vadd.xlane.f32.xlu0 %v162_v13 }
 0x20b   :  { %v116_v14 = vpop.xlane.xlu0 %115 }
 0x20c   :  { %163 = vlog2.f32 %v116_v14 }
 0x219   :  { %v164_v15 = vpop.eup %163 }
 0x21a   :  { %v118_v16 = vmul.f32 0.6931472, %v164_v15 }
 0x21c   :  { %v119_v17 = vsub.f32 %v112_v11, %v118_v16 }
 0x21e   :  { %120 = vst [vmem:[#allocation7] sm:$0xff] %v119_v17 }
 0x21f   :  { %216 = shalt.err (!%p213_p0)
}
 0x220   :  { %130 = dma.vmem_to_hbm [thread:$0]  %s128_s25, 128, %s273_s3, [#allocation4]  }
 0x221   :  { %229 = dma.done.wait [#allocation4], 128  }
 0x222   :  { %230 = vsyncadd [#allocation4], 4294967168 }
 0x223   :  { %134 = vsyncpa [#allocation3], 1 }
 0x224   :  { %135 = vsyncpa [#allocation6], 1 }
 0x225   :  { %136 = vsyncpa [#allocation4], 1 }

</bundles_post_ra>
